<compile_context>
chip_gen: v7x
topology: tpu7x:2x2x1
jax: 0.10.0
libtpu: 0.0.40
codegen_flags: <defaults>
</compile_context>

<pallas_src>
import functools

import jax
import jax.numpy as jnp
from jax.experimental import pallas as pl
from jax.experimental.pallas import tpu as pltpu

# Encoder: 46->40->35->25->20->18, Decoder: 18->20->25->35->40->46
LAYER_DIMS = [(46, 40), (40, 35), (35, 25), (25, 20), (20, 18),
              (18, 20), (20, 25), (25, 35), (35, 40), (40, 46)]
NUM_LAYERS = len(LAYER_DIMS)
D_IN = 46
D_OUT = 46
PAD = 128          # lane-padded feature width used for the MXU

# Layers 4 (encoder output) and 9 (decoder output) have NO tanh after them.
_NO_TANH = (4, NUM_LAYERS - 1)


def ae_kernel(x_ref, w_ref, b_ref, o_ref, *, act_dtype):
    """One batch-tile of the full 10-layer MLP.

    x_ref: (TB, 46)  f32        w_ref: (10, 128, 128) bf16
    b_ref: (10, 128) f32        o_ref: (TB, 46) f32
    """
    tb = x_ref.shape[0]
    # Lane-pad 46 -> 128 entirely in registers (no VMEM scratch round-trip).
    x = x_ref[...]                                                 # (TB, 46) f32
    h = jnp.concatenate(
        [x, jnp.zeros((tb, PAD - D_IN), jnp.float32)], axis=-1)    # (TB, 128) f32
    h = h.astype(act_dtype)

    # Static Python loop -> fully unrolled chain of MXU matmuls + VPU/EUP tanh.
    for i in range(NUM_LAYERS):
        acc = jnp.dot(h.astype(jnp.bfloat16), w_ref[i],
                      preferred_element_type=jnp.float32)          # (TB, 128) f32
        # Bias add + tanh in act_dtype (bf16 on v6e/v7x, f32 fallback for v5e).
        # Per-layer (1,128) bias cast is negligible; keeps HBM bias in f32.
        h = acc.astype(act_dtype) + b_ref[i][None, :].astype(act_dtype)
        if i not in _NO_TANH:
            h = jnp.tanh(h)

    # Store only the 46 real lanes (masked vst, but saves ~3x HBM write traffic).
    o_ref[...] = h[:, :D_OUT].astype(o_ref.dtype)


@functools.partial(jax.jit, static_argnames=("block_b", "act_dtype"))
def ae_forward(x, w_stack, b_stack, *, block_b=2048, act_dtype=jnp.bfloat16):
    """x: (B, 46) float32 -> (B, 46) float32."""
    B, d = x.shape
    assert d == D_IN

    # Batch tile: multiple of 8 sublanes, at most block_b; if the whole (padded)
    # batch fits in one tile, split it in two so a v7x megacore gets 2 grid steps.
    b_pad8 = ((B + 7) // 8) * 8
    tb = min(block_b, b_pad8)
    tb = ((tb + 7) // 8) * 8                       # enforce sublane multiple
    if b_pad8 >= 16 and b_pad8 <= tb:
        tb = (((b_pad8 + 1) // 2 + 7) // 8) * 8    # >= 2 grid steps when possible
    b_pad = ((B + tb - 1) // tb) * tb

    # Only the batch dim is padded (cheap); the feature dim stays 46 wide in HBM.
    x_p = x if b_pad == B else jnp.pad(x, ((0, b_pad - B), (0, 0)))
    w_bf = w_stack.astype(jnp.bfloat16)

    flops = 2 * NUM_LAYERS * PAD * PAD * b_pad
    transcendentals = (NUM_LAYERS - len(_NO_TANH)) * PAD * b_pad
    bytes_accessed = (x_p.size * 4 + b_pad * D_OUT * 4
                      + w_bf.size * 2 + b_stack.size * 4)

    kernel = functools.partial(ae_kernel, act_dtype=act_dtype)

    out_p = pl.pallas_call(
        kernel,
        out_shape=jax.ShapeDtypeStruct((b_pad, D_OUT), jnp.float32),
        grid_spec=pltpu.PrefetchScalarGridSpec(
            num_scalar_prefetch=0,
            grid=(b_pad // tb,),
            in_specs=[
                pl.BlockSpec((tb, D_IN), lambda i: (i, 0)),
                pl.BlockSpec((NUM_LAYERS, PAD, PAD), lambda i: (0, 0, 0)),
                pl.BlockSpec((NUM_LAYERS, PAD), lambda i: (0, 0)),
            ],
            out_specs=pl.BlockSpec((tb, D_OUT), lambda i: (i, 0)),
        ),
        compiler_params=pltpu.CompilerParams(
            dimension_semantics=("parallel",)),
        cost_estimate=pl.CostEstimate(
            flops=flops,
            transcendentals=transcendentals,
            bytes_accessed=bytes_accessed),
    )(x_p, w_bf, b_stack)

    return out_p[:B]


def init_params(key):
    """Deterministic init mimicking torch.nn.Linear default (U[-1/sqrt(fan_in), ...]).

    Returns zero-padded stacked weights (10, PAD, PAD) and biases (10, PAD) in f32.
    PyTorch Linear stores weight as (out, in); we store the transpose (in, out)
    so the kernel computes h @ W + b.
    """
    w_stack = jnp.zeros((NUM_LAYERS, PAD, PAD), jnp.float32)
    b_stack = jnp.zeros((NUM_LAYERS, PAD), jnp.float32)
    keys = jax.random.split(key, 2 * NUM_LAYERS)
    for i, (din, dout) in enumerate(LAYER_DIMS):
        bound = 1.0 / (din ** 0.5)
        w = jax.random.uniform(keys[2 * i], (din, dout), jnp.float32, -bound, bound)
        b = jax.random.uniform(keys[2 * i + 1], (dout,), jnp.float32, -bound, bound)
        w_stack = w_stack.at[i, :din, :dout].set(w)
        b_stack = b_stack.at[i, :dout].set(b)
    return w_stack, b_stack


def ae_reference(x, w_stack, b_stack, *, act_dtype=jnp.float32):
    """Pure-JAX reference mirroring the kernel's dtype path (bf16 MXU, f32 acc)."""
    h = x.astype(act_dtype)
    for i, (din, dout) in enumerate(LAYER_DIMS):
        w = w_stack[i, :din, :dout].astype(jnp.bfloat16)
        acc = jnp.dot(h.astype(jnp.bfloat16), w, preferred_element_type=jnp.float32)
        h = acc.astype(act_dtype) + b_stack[i, :dout].astype(act_dtype)
        if i not in _NO_TANH:
            h = jnp.tanh(h)
    return h.astype(jnp.float32)


if __name__ == "__main__":
    key = jax.random.PRNGKey(0)
    kx, kp = jax.random.split(key)
    w_stack, b_stack = init_params(kp)

    # 1) f32-activation path (v5e-safe), tiny batch -> single grid step.
    B = 4
    x = jax.random.normal(kx, (B, D_IN), jnp.float32)
    out = jax.block_until_ready(
        ae_forward(x, w_stack, b_stack, act_dtype=jnp.float32))
    ref = ae_reference(x, w_stack, b_stack, act_dtype=jnp.float32)
    assert out.shape == (B, D_OUT), out.shape
    assert jnp.allclose(out, ref, atol=1e-2, rtol=1e-2), (
        float(jnp.max(jnp.abs(out - ref))))

    # 2) default bf16-activation path; batch large enough to split into 2 grid steps.
    B2 = 64
    x2 = jax.random.normal(kx, (B2, D_IN), jnp.float32)
    out2 = jax.block_until_ready(ae_forward(x2, w_stack, b_stack))
    ref2 = ae_reference(x2, w_stack, b_stack, act_dtype=jnp.bfloat16)
    assert out2.shape == (B2, D_OUT), out2.shape
    assert jnp.allclose(out2, ref2, atol=5e-2, rtol=5e-2), (
        float(jnp.max(jnp.abs(out2 - ref2))))

    # 3) ragged batch + non-multiple-of-8 block_b (exercises tb rounding & padding).
    B3 = 37
    x3 = jax.random.normal(kx, (B3, D_IN), jnp.float32)
    out3 = jax.block_until_ready(ae_forward(x3, w_stack, b_stack, block_b=20))
    ref3 = ae_reference(x3, w_stack, b_stack, act_dtype=jnp.bfloat16)
    assert out3.shape == (B3, D_OUT), out3.shape
    assert jnp.allclose(out3, ref3, atol=5e-2, rtol=5e-2), (
        float(jnp.max(jnp.abs(out3 - ref3))))

    print("KERNEL_OK")
</pallas_src>

<mosaic_0001>
module attributes {stable_mosaic.version = 11 : i64} {
  func.func @ae_kernel(%arg0: i32, %arg1: memref<8x46xf32, #tpu.memory_space<vmem>>, %arg2: memref<10x128x128xbf16, #tpu.memory_space<vmem>>, %arg3: memref<10x128xf32, #tpu.memory_space<vmem>>, %arg4: memref<8x46xf32, #tpu.memory_space<vmem>>) attributes {dimension_semantics = [#tpu.dimension_semantics<parallel>], iteration_bounds = array<i64: 1>, scalar_prefetch = 0 : i64, scratch_operands = 0 : i64, tpu.core_type = #tpu.core_type<tc>, window_params = [{transform_indices = @transform_0, window_bounds = array<i64: 8, 46>}, {pipeline_mode = #tpu.pipeline_mode<synchronous>, transform_indices = @transform_1, window_bounds = array<i64: 10, 128, 128>}, {pipeline_mode = #tpu.pipeline_mode<synchronous>, transform_indices = @transform_2, window_bounds = array<i64: 10, 128>}, {transform_indices = @transform_3, window_bounds = array<i64: 8, 46>}]} {
    %c0 = arith.constant 0 : index
    %c0_0 = arith.constant 0 : index
    %0 = vector.load %arg1[%c0, %c0_0] : memref<8x46xf32, #tpu.memory_space<vmem>>, vector<8x46xf32>
    %cst = arith.constant 0.000000e+00 : f32
    %1 = vector.broadcast %cst : f32 to vector<8x82xf32>
    %2 = tpu.concatenate %0, %1 in 1 : vector<8x46xf32>, vector<8x82xf32> -> vector<8x128xf32>
    %3 = arith.truncf %2 : vector<8x128xf32> to vector<8x128xbf16>
    %c0_1 = arith.constant 0 : index
    %c0_2 = arith.constant 0 : index
    %c0_3 = arith.constant 0 : index
    %4 = vector.load %arg2[%c0_1, %c0_2, %c0_3] : memref<10x128x128xbf16, #tpu.memory_space<vmem>>, vector<1x128x128xbf16>
    %5 = vector.shape_cast %4 : vector<1x128x128xbf16> to vector<128x128xbf16>
    %cst_4 = arith.constant dense<0.000000e+00> : vector<8x128xf32>
    %6 = tpu.matmul %3, %5, %cst_4 {dimension_numbers = #tpu.dot_dimension_numbers<[1], [0], [0], [1], [0, 0, 1, 1], [], []>} : vector<8x128xbf16>, vector<128x128xbf16>, vector<8x128xf32> -> vector<8x128xf32>
    %c0_5 = arith.constant 0 : index
    %c0_6 = arith.constant 0 : index
    %7 = vector.load %arg3[%c0_5, %c0_6] : memref<10x128xf32, #tpu.memory_space<vmem>>, vector<1x128xf32>
    %8 = vector.shape_cast %7 : vector<1x128xf32> to vector<128xf32>
    %9 = vector.shape_cast %8 : vector<128xf32> to vector<1x128xf32>
    %10 = vector.broadcast %9 : vector<1x128xf32> to vector<8x128xf32>
    %11 = arith.addf %6, %10 : vector<8x128xf32>
    %12 = math.tanh %11 : vector<8x128xf32>
    %13 = arith.truncf %12 : vector<8x128xf32> to vector<8x128xbf16>
    %c1 = arith.constant 1 : index
    %c0_7 = arith.constant 0 : index
    %c0_8 = arith.constant 0 : index
    %14 = vector.load %arg2[%c1, %c0_7, %c0_8] : memref<10x128x128xbf16, #tpu.memory_space<vmem>>, vector<1x128x128xbf16>
    %15 = vector.shape_cast %14 : vector<1x128x128xbf16> to vector<128x128xbf16>
    %cst_9 = arith.constant dense<0.000000e+00> : vector<8x128xf32>
    %16 = tpu.matmul %13, %15, %cst_9 {dimension_numbers = #tpu.dot_dimension_numbers<[1], [0], [0], [1], [0, 0, 1, 1], [], []>} : vector<8x128xbf16>, vector<128x128xbf16>, vector<8x128xf32> -> vector<8x128xf32>
    %c1_10 = arith.constant 1 : index
    %c0_11 = arith.constant 0 : index
    %17 = vector.load %arg3[%c1_10, %c0_11] : memref<10x128xf32, #tpu.memory_space<vmem>>, vector<1x128xf32>
    %18 = vector.shape_cast %17 : vector<1x128xf32> to vector<128xf32>
    %19 = vector.shape_cast %18 : vector<128xf32> to vector<1x128xf32>
    %20 = vector.broadcast %19 : vector<1x128xf32> to vector<8x128xf32>
    %21 = arith.addf %16, %20 : vector<8x128xf32>
    %22 = math.tanh %21 : vector<8x128xf32>
    %23 = arith.truncf %22 : vector<8x128xf32> to vector<8x128xbf16>
    %c2 = arith.constant 2 : index
    %c0_12 = arith.constant 0 : index
    %c0_13 = arith.constant 0 : index
    %24 = vector.load %arg2[%c2, %c0_12, %c0_13] : memref<10x128x128xbf16, #tpu.memory_space<vmem>>, vector<1x128x128xbf16>
    %25 = vector.shape_cast %24 : vector<1x128x128xbf16> to vector<128x128xbf16>
    %cst_14 = arith.constant dense<0.000000e+00> : vector<8x128xf32>
    %26 = tpu.matmul %23, %25, %cst_14 {dimension_numbers = #tpu.dot_dimension_numbers<[1], [0], [0], [1], [0, 0, 1, 1], [], []>} : vector<8x128xbf16>, vector<128x128xbf16>, vector<8x128xf32> -> vector<8x128xf32>
    %c2_15 = arith.constant 2 : index
    %c0_16 = arith.constant 0 : index
    %27 = vector.load %arg3[%c2_15, %c0_16] : memref<10x128xf32, #tpu.memory_space<vmem>>, vector<1x128xf32>
    %28 = vector.shape_cast %27 : vector<1x128xf32> to vector<128xf32>
    %29 = vector.shape_cast %28 : vector<128xf32> to vector<1x128xf32>
    %30 = vector.broadcast %29 : vector<1x128xf32> to vector<8x128xf32>
    %31 = arith.addf %26, %30 : vector<8x128xf32>
    %32 = math.tanh %31 : vector<8x128xf32>
    %33 = arith.truncf %32 : vector<8x128xf32> to vector<8x128xbf16>
    %c3 = arith.constant 3 : index
    %c0_17 = arith.constant 0 : index
    %c0_18 = arith.constant 0 : index
    %34 = vector.load %arg2[%c3, %c0_17, %c0_18] : memref<10x128x128xbf16, #tpu.memory_space<vmem>>, vector<1x128x128xbf16>
    %35 = vector.shape_cast %34 : vector<1x128x128xbf16> to vector<128x128xbf16>
    %cst_19 = arith.constant dense<0.000000e+00> : vector<8x128xf32>
    %36 = tpu.matmul %33, %35, %cst_19 {dimension_numbers = #tpu.dot_dimension_numbers<[1], [0], [0], [1], [0, 0, 1, 1], [], []>} : vector<8x128xbf16>, vector<128x128xbf16>, vector<8x128xf32> -> vector<8x128xf32>
    %c3_20 = arith.constant 3 : index
    %c0_21 = arith.constant 0 : index
    %37 = vector.load %arg3[%c3_20, %c0_21] : memref<10x128xf32, #tpu.memory_space<vmem>>, vector<1x128xf32>
    %38 = vector.shape_cast %37 : vector<1x128xf32> to vector<128xf32>
    %39 = vector.shape_cast %38 : vector<128xf32> to vector<1x128xf32>
    %40 = vector.broadcast %39 : vector<1x128xf32> to vector<8x128xf32>
    %41 = arith.addf %36, %40 : vector<8x128xf32>
    %42 = math.tanh %41 : vector<8x128xf32>
    %43 = arith.truncf %42 : vector<8x128xf32> to vector<8x128xbf16>
    %c4 = arith.constant 4 : index
    %c0_22 = arith.constant 0 : index
    %c0_23 = arith.constant 0 : index
    %44 = vector.load %arg2[%c4, %c0_22, %c0_23] : memref<10x128x128xbf16, #tpu.memory_space<vmem>>, vector<1x128x128xbf16>
    %45 = vector.shape_cast %44 : vector<1x128x128xbf16> to vector<128x128xbf16>
    %cst_24 = arith.constant dense<0.000000e+00> : vector<8x128xf32>
    %46 = tpu.matmul %43, %45, %cst_24 {dimension_numbers = #tpu.dot_dimension_numbers<[1], [0], [0], [1], [0, 0, 1, 1], [], []>} : vector<8x128xbf16>, vector<128x128xbf16>, vector<8x128xf32> -> vector<8x128xf32>
    %c4_25 = arith.constant 4 : index
    %c0_26 = arith.constant 0 : index
    %47 = vector.load %arg3[%c4_25, %c0_26] : memref<10x128xf32, #tpu.memory_space<vmem>>, vector<1x128xf32>
    %48 = vector.shape_cast %47 : vector<1x128xf32> to vector<128xf32>
    %49 = vector.shape_cast %48 : vector<128xf32> to vector<1x128xf32>
    %50 = vector.broadcast %49 : vector<1x128xf32> to vector<8x128xf32>
    %51 = arith.addf %46, %50 : vector<8x128xf32>
    %52 = arith.truncf %51 : vector<8x128xf32> to vector<8x128xbf16>
    %c5 = arith.constant 5 : index
    %c0_27 = arith.constant 0 : index
    %c0_28 = arith.constant 0 : index
    %53 = vector.load %arg2[%c5, %c0_27, %c0_28] : memref<10x128x128xbf16, #tpu.memory_space<vmem>>, vector<1x128x128xbf16>
    %54 = vector.shape_cast %53 : vector<1x128x128xbf16> to vector<128x128xbf16>
    %cst_29 = arith.constant dense<0.000000e+00> : vector<8x128xf32>
    %55 = tpu.matmul %52, %54, %cst_29 {dimension_numbers = #tpu.dot_dimension_numbers<[1], [0], [0], [1], [0, 0, 1, 1], [], []>} : vector<8x128xbf16>, vector<128x128xbf16>, vector<8x128xf32> -> vector<8x128xf32>
    %c5_30 = arith.constant 5 : index
    %c0_31 = arith.constant 0 : index
    %56 = vector.load %arg3[%c5_30, %c0_31] : memref<10x128xf32, #tpu.memory_space<vmem>>, vector<1x128xf32>
    %57 = vector.shape_cast %56 : vector<1x128xf32> to vector<128xf32>
    %58 = vector.shape_cast %57 : vector<128xf32> to vector<1x128xf32>
    %59 = vector.broadcast %58 : vector<1x128xf32> to vector<8x128xf32>
    %60 = arith.addf %55, %59 : vector<8x128xf32>
    %61 = math.tanh %60 : vector<8x128xf32>
    %62 = arith.truncf %61 : vector<8x128xf32> to vector<8x128xbf16>
    %c6 = arith.constant 6 : index
    %c0_32 = arith.constant 0 : index
    %c0_33 = arith.constant 0 : index
    %63 = vector.load %arg2[%c6, %c0_32, %c0_33] : memref<10x128x128xbf16, #tpu.memory_space<vmem>>, vector<1x128x128xbf16>
    %64 = vector.shape_cast %63 : vector<1x128x128xbf16> to vector<128x128xbf16>
    %cst_34 = arith.constant dense<0.000000e+00> : vector<8x128xf32>
    %65 = tpu.matmul %62, %64, %cst_34 {dimension_numbers = #tpu.dot_dimension_numbers<[1], [0], [0], [1], [0, 0, 1, 1], [], []>} : vector<8x128xbf16>, vector<128x128xbf16>, vector<8x128xf32> -> vector<8x128xf32>
    %c6_35 = arith.constant 6 : index
    %c0_36 = arith.constant 0 : index
    %66 = vector.load %arg3[%c6_35, %c0_36] : memref<10x128xf32, #tpu.memory_space<vmem>>, vector<1x128xf32>
    %67 = vector.shape_cast %66 : vector<1x128xf32> to vector<128xf32>
    %68 = vector.shape_cast %67 : vector<128xf32> to vector<1x128xf32>
    %69 = vector.broadcast %68 : vector<1x128xf32> to vector<8x128xf32>
    %70 = arith.addf %65, %69 : vector<8x128xf32>
    %71 = math.tanh %70 : vector<8x128xf32>
    %72 = arith.truncf %71 : vector<8x128xf32> to vector<8x128xbf16>
    %c7 = arith.constant 7 : index
    %c0_37 = arith.constant 0 : index
    %c0_38 = arith.constant 0 : index
    %73 = vector.load %arg2[%c7, %c0_37, %c0_38] : memref<10x128x128xbf16, #tpu.memory_space<vmem>>, vector<1x128x128xbf16>
    %74 = vector.shape_cast %73 : vector<1x128x128xbf16> to vector<128x128xbf16>
    %cst_39 = arith.constant dense<0.000000e+00> : vector<8x128xf32>
    %75 = tpu.matmul %72, %74, %cst_39 {dimension_numbers = #tpu.dot_dimension_numbers<[1], [0], [0], [1], [0, 0, 1, 1], [], []>} : vector<8x128xbf16>, vector<128x128xbf16>, vector<8x128xf32> -> vector<8x128xf32>
    %c7_40 = arith.constant 7 : index
    %c0_41 = arith.constant 0 : index
    %76 = vector.load %arg3[%c7_40, %c0_41] : memref<10x128xf32, #tpu.memory_space<vmem>>, vector<1x128xf32>
    %77 = vector.shape_cast %76 : vector<1x128xf32> to vector<128xf32>
    %78 = vector.shape_cast %77 : vector<128xf32> to vector<1x128xf32>
    %79 = vector.broadcast %78 : vector<1x128xf32> to vector<8x128xf32>
    %80 = arith.addf %75, %79 : vector<8x128xf32>
    %81 = math.tanh %80 : vector<8x128xf32>
    %82 = arith.truncf %81 : vector<8x128xf32> to vector<8x128xbf16>
    %c8 = arith.constant 8 : index
    %c0_42 = arith.constant 0 : index
    %c0_43 = arith.constant 0 : index
    %83 = vector.load %arg2[%c8, %c0_42, %c0_43] : memref<10x128x128xbf16, #tpu.memory_space<vmem>>, vector<1x128x128xbf16>
    %84 = vector.shape_cast %83 : vector<1x128x128xbf16> to vector<128x128xbf16>
    %cst_44 = arith.constant dense<0.000000e+00> : vector<8x128xf32>
    %85 = tpu.matmul %82, %84, %cst_44 {dimension_numbers = #tpu.dot_dimension_numbers<[1], [0], [0], [1], [0, 0, 1, 1], [], []>} : vector<8x128xbf16>, vector<128x128xbf16>, vector<8x128xf32> -> vector<8x128xf32>
    %c8_45 = arith.constant 8 : index
    %c0_46 = arith.constant 0 : index
    %86 = vector.load %arg3[%c8_45, %c0_46] : memref<10x128xf32, #tpu.memory_space<vmem>>, vector<1x128xf32>
    %87 = vector.shape_cast %86 : vector<1x128xf32> to vector<128xf32>
    %88 = vector.shape_cast %87 : vector<128xf32> to vector<1x128xf32>
    %89 = vector.broadcast %88 : vector<1x128xf32> to vector<8x128xf32>
    %90 = arith.addf %85, %89 : vector<8x128xf32>
    %91 = math.tanh %90 : vector<8x128xf32>
    %92 = arith.truncf %91 : vector<8x128xf32> to vector<8x128xbf16>
    %c9 = arith.constant 9 : index
    %c0_47 = arith.constant 0 : index
    %c0_48 = arith.constant 0 : index
    %93 = vector.load %arg2[%c9, %c0_47, %c0_48] : memref<10x128x128xbf16, #tpu.memory_space<vmem>>, vector<1x128x128xbf16>
    %94 = vector.shape_cast %93 : vector<1x128x128xbf16> to vector<128x128xbf16>
    %cst_49 = arith.constant dense<0.000000e+00> : vector<8x128xf32>
    %95 = tpu.matmul %92, %94, %cst_49 {dimension_numbers = #tpu.dot_dimension_numbers<[1], [0], [0], [1], [0, 0, 1, 1], [], []>} : vector<8x128xbf16>, vector<128x128xbf16>, vector<8x128xf32> -> vector<8x128xf32>
    %c9_50 = arith.constant 9 : index
    %c0_51 = arith.constant 0 : index
    %96 = vector.load %arg3[%c9_50, %c0_51] : memref<10x128xf32, #tpu.memory_space<vmem>>, vector<1x128xf32>
    %97 = vector.shape_cast %96 : vector<1x128xf32> to vector<128xf32>
    %98 = vector.shape_cast %97 : vector<128xf32> to vector<1x128xf32>
    %99 = vector.broadcast %98 : vector<1x128xf32> to vector<8x128xf32>
    %100 = arith.addf %95, %99 : vector<8x128xf32>
    %101 = vector.extract_strided_slice %100 {offsets = [0, 0], sizes = [8, 46], strides = [1, 1]} : vector<8x128xf32> to vector<8x46xf32>
    %c0_52 = arith.constant 0 : index
    %c0_53 = arith.constant 0 : index
    %102 = vector.load %arg4[%c0_52, %c0_53] : memref<8x46xf32, #tpu.memory_space<vmem>>, vector<8x46xf32>
    tpu.vector_store %arg4[%c0_52, %c0_53], %101 {strides = array<i32>} : memref<8x46xf32, #tpu.memory_space<vmem>>, vector<8x46xf32>,
    return
  }
  func.func @transform_0(%arg0: i32) -> (i32, i32) {
    %c0_i32 = arith.constant 0 : i32
    %c0_i32_0 = arith.constant 0 : i32
    return %arg0, %c0_i32 : i32, i32
  }
  func.func @transform_1(%arg0: i32) -> (i32, i32, i32) {
    %c0_i32 = arith.constant 0 : i32
    %c0_i32_0 = arith.constant 0 : i32
    %c0_i32_1 = arith.constant 0 : i32
    %c0_i32_2 = arith.constant 0 : i32
    return %c0_i32, %c0_i32_0, %c0_i32_1 : i32, i32, i32
  }
  func.func @transform_2(%arg0: i32) -> (i32, i32) {
    %c0_i32 = arith.constant 0 : i32
    %c0_i32_0 = arith.constant 0 : i32
    %c0_i32_1 = arith.constant 0 : i32
    return %c0_i32, %c0_i32_0 : i32, i32
  }
  func.func @transform_3(%arg0: i32) -> (i32, i32) {
    %c0_i32 = arith.constant 0 : i32
    %c0_i32_0 = arith.constant 0 : i32
    return %arg0, %c0_i32 : i32, i32
  }
}

</mosaic_0001>

<bundles_post_ra>
// kernel: ae_forward.1
= control target key start
LH: loop header
LB: loop body
LE: loop exit
PB: predicated region body
PF: predicated region fallthrough
CT: control target
= control target key end

     0   :  { %v1765_v0 = vmov 0.0   ;;  %vm1766_vm0 = vmmov 0   ;;  %vm16_vm1 = vcmask 375808   ;;  %s2166_s1 = inlined_call_operand.vmem [shape: bf16[10,128,128], index: 1, kind: input, shape index: {}]   ;;  %s2167_s0 = inlined_call_operand.vmem [shape: f32[8,46], index: 0, kind: input, shape index: {}]   ;;  %s2168_s2 = inlined_call_operand.vmem [shape: f32[10,128], index: 2, kind: input, shape index: {}]   ;;  %s2169_s3 = inlined_call_operand.vmem [shape: f32[8,46], index: 3, kind: output, shape index: {}]  }
   0x1   :  { %1467 = vmatprep.subr.bf16.mxu0 %v1765_v0  ;;  %v1669_v1 = vld [vmem:[%s2166_s1] sm:$0xff]   ;;  %1483 = vmatprep.mubr.msk.bf16.mxu0 %vm1766_vm0, %v1765_v0  ;;  %v1670_v2 = vld [vmem:[%s2166_s1 + $0x8] sm:$0xff]   ;;  %v1671_v3 = vld [vmem:[%s2166_s1 + $0x10] sm:$0xff]  }
   0x2   :  { %1487 = vmatprep.subr.bf16.mxu1 %v1765_v0  ;;  %1503 = vmatprep.mubr.msk.bf16.mxu1 %vm1766_vm0, %v1765_v0  ;;  %v1677_v4 = vld [vmem:[%s2166_s1 + $0x40] sm:$0xff]   ;;  %v1672_v5 = vld [vmem:[%s2166_s1 + $0x18] sm:$0xff]   ;;  %v1678_v6 = vld [vmem:[%s2166_s1 + $0x48] sm:$0xff]  }
   0x3   :  { %1468 = vmatpush3.bf16.msra.mxu0 %v1669_v1  ;;  %1488 = vmatpush3.bf16.msra.mxu1 %v1677_v4  ;;  %v1673_v7 = vld [vmem:[%s2166_s1 + $0x20] sm:$0xff]   ;;  %v1679_v8 = vld [vmem:[%s2166_s1 + $0x50] sm:$0xff]   ;;  %v1674_v9 = vld [vmem:[%s2166_s1 + $0x28] sm:$0xff]  }
   0x4   :  { %1469 = vmatprep.subr.bf16.mxu0 %v1765_v0  ;;  %1489 = vmatprep.subr.bf16.mxu1 %v1765_v0  ;;  %v1680_v10 = vld [vmem:[%s2166_s1 + $0x58] sm:$0xff]   ;;  %v1675_v11 = vld [vmem:[%s2166_s1 + $0x30] sm:$0xff]   ;;  %vm1149_vm2 = vmpackc.low %vm16_vm1, %vm16_vm1 }
   0x5   :  { %v1676_v12 = vld [vmem:[%s2166_s1 + $0x38] sm:$0xff]   ;;  %v15_v13 = vld [vmem:[%s2167_s0] sm:$0xff]  ;;  %v1682_v16 = vld [vmem:[%s2166_s1 + $0x68] sm:$0xff]  }
   0x6   :  { %v1150_v14 = vpack.c.bf16 %v15_v13, %v15_v13  ;;  %v1681_v15 = vld [vmem:[%s2166_s1 + $0x60] sm:$0xff]   ;;  %v1683_v17 = vld [vmem:[%s2166_s1 + $0x70] sm:$0xff]   ;;  %v1684_v18 = vld [vmem:[%s2166_s1 + $0x78] sm:$0xff]  }
   0x7   :  { %1470 = vmatpush3.bf16.msra.mxu0 %v1670_v2  ;;  %1490 = vmatpush3.bf16.msra.mxu1 %v1678_v6  ;;  %v1685_v19 = vld [vmem:[%s2166_s1 + $0x80] sm:$0xff]   ;;  %v1686_v20 = vld [vmem:[%s2166_s1 + $0x88] sm:$0xff]   ;;  %v1687_v21 = vld [vmem:[%s2166_s1 + $0x90] sm:$0xff]  }
   0x8   :  { %1471 = vmatprep.subr.bf16.mxu0 %v1765_v0  ;;  %1491 = vmatprep.subr.bf16.mxu1 %v1765_v0  ;;  %v1688_v22 = vld [vmem:[%s2166_s1 + $0x98] sm:$0xff]   ;;  %v1140_v23 = vld [vmem:[%s2168_s2] ss:$0 sm:$0xff]  ;;  %v1690_v32 = vld [vmem:[%s2166_s1 + $0xa8] sm:$0xff]  }
   0x9   :  { %v1689_v31 = vld [vmem:[%s2166_s1 + $0xa0] sm:$0xff]   ;;  %v1691_v33 = vld [vmem:[%s2166_s1 + $0xb0] sm:$0xff]   ;;  %v1692_v34 = vld [vmem:[%s2166_s1 + $0xb8] sm:$0xff]  }
   0xa   :  { %v1693_v35 = vld [vmem:[%s2166_s1 + $0xc0] sm:$0xff]   ;;  %v1694_v36 = vld [vmem:[%s2166_s1 + $0xc8] sm:$0xff]   ;;  %v1695_v37 = vld [vmem:[%s2166_s1 + $0xd0] sm:$0xff]  }
   0xb   :  { %1472 = vmatpush3.bf16.msra.mxu0 %v1671_v3  ;;  %1492 = vmatpush3.bf16.msra.mxu1 %v1679_v8  ;;  %v1696_v38 = vld [vmem:[%s2166_s1 + $0xd8] sm:$0xff]   ;;  %v1168_v39 = vld [vmem:[%s2168_s2 + $0x1] ss:$0 sm:$0xff]  ;;  %v1698_v48 = vld [vmem:[%s2166_s1 + $0xe8] sm:$0xff]  }
   0xc   :  { %1473 = vmatprep.subr.bf16.mxu0 %v1765_v0  ;;  %1493 = vmatprep.subr.bf16.mxu1 %v1765_v0  ;;  %v1697_v47 = vld [vmem:[%s2166_s1 + $0xe0] sm:$0xff]   ;;  %v1699_v49 = vld [vmem:[%s2166_s1 + $0xf0] sm:$0xff]   ;;  %v1700_v50 = vld [vmem:[%s2166_s1 + $0xf8] sm:$0xff]  }
   0xd   :  { %v1701_v51 = vld [vmem:[%s2166_s1 + $0x100] sm:$0xff]   ;;  %v1702_v52 = vld [vmem:[%s2166_s1 + $0x108] sm:$0xff]   ;;  %v1703_v53 = vld [vmem:[%s2166_s1 + $0x110] sm:$0xff]  }
   0xe   :  { %v1704_v54 = vld [vmem:[%s2166_s1 + $0x118] sm:$0xff]   ;;  %v1193_v55 = vld [vmem:[%s2168_s2 + $0x2] ss:$0 sm:$0xff]  ;;  %v1706_v1 = vld [vmem:[%s2166_s1 + $0x128] sm:$0xff]  }
   0xf   :  { %1474 = vmatpush3.bf16.msra.mxu0 %v1672_v5  ;;  %1494 = vmatpush3.bf16.msra.mxu1 %v1680_v10  ;;  %v1705_v63 = vld [vmem:[%s2166_s1 + $0x120] sm:$0xff]   ;;  %v1707_v2 = vld [vmem:[%s2166_s1 + $0x130] sm:$0xff]   ;;  %v1708_v3 = vld [vmem:[%s2166_s1 + $0x138] sm:$0xff]  }
  0x10   :  { %1475 = vmatprep.subr.bf16.mxu0 %v1765_v0  ;;  %1495 = vmatprep.subr.bf16.mxu1 %v1765_v0  ;;  %v1709_v4 = vld [vmem:[%s2166_s1 + $0x140] sm:$0xff]   ;;  %v1710_v5 = vld [vmem:[%s2166_s1 + $0x148] sm:$0xff]   ;;  %v1711_v6 = vld [vmem:[%s2166_s1 + $0x150] sm:$0xff]  }
  0x11   :  { %v1713_v8 = vld [vmem:[%s2166_s1 + $0x160] sm:$0xff]   ;;  %v1715_v10 = vld [vmem:[%s2166_s1 + $0x170] sm:$0xff]  }
  0x13   :  { %1476 = vmatpush3.bf16.msra.mxu0 %v1673_v7  ;;  %1496 = vmatpush3.bf16.msra.mxu1 %v1681_v15  ;;  %v1712_v7 = vld [vmem:[%s2166_s1 + $0x158] sm:$0xff]  }
  0x14   :  { %1477 = vmatprep.subr.bf16.mxu0 %v1765_v0  ;;  %1497 = vmatprep.subr.bf16.mxu1 %v1765_v0 }
  0x17   :  { %1478 = vmatpush3.bf16.msra.mxu0 %v1674_v9  ;;  %1498 = vmatpush3.bf16.msra.mxu1 %v1682_v16  ;;  %v1714_v9 = vld [vmem:[%s2166_s1 + $0x168] sm:$0xff]  }
  0x18   :  { %1479 = vmatprep.subr.bf16.mxu0 %v1765_v0  ;;  %1499 = vmatprep.subr.bf16.mxu1 %v1765_v0 }
  0x1b   :  { %1480 = vmatpush3.bf16.msra.mxu0 %v1675_v11  ;;  %1500 = vmatpush3.bf16.msra.mxu1 %v1683_v17  ;;  %v1218_v11 = vld [vmem:[%s2168_s2 + $0x3] ss:$0 sm:$0xff] }
  0x1c   :  { %1481 = vmatprep.subr.bf16.mxu0 %v1765_v0  ;;  %1501 = vmatprep.subr.bf16.mxu1 %v1765_v0 }
  0x1f   :  { %1482 = vmatpush3.bf16.msra.mxu0 %v1676_v12  ;;  %1502 = vmatpush3.bf16.msra.mxu1 %v1684_v18 }
  0x20   :  { %1507 = vmatprep.subr.bf16.mxu0 %v1765_v0  ;;  %1527 = vmatprep.subr.bf16.mxu1 %v1765_v0 }
  0x22   :  { %1484 = vmatmul.mubr.msk.bf16.vlgmr.msra.gmra.mrb[0].mxu0 %vm1149_vm2, %v1150_v14 }
  0x23   :  { %1523 = vmatprep.mubr.msk.bf16.mxu0 %vm1766_vm0, %v1765_v0  ;;  %1508 = vmatpush3.bf16.msra.mxu0 %v1685_v19  ;;  %v1716_v19 = vld [vmem:[%s2166_s1 + $0x178] sm:$0xff]  }
  0x24   :  { %1509 = vmatprep.subr.bf16.mxu0 %v1765_v0 }
  0x27   :  { %1510 = vmatpush3.bf16.msra.mxu0 %v1686_v20  ;;  %v1717_v20 = vld [vmem:[%s2166_s1 + $0x180] sm:$0xff]  }
  0x28   :  { %1511 = vmatprep.subr.bf16.mxu0 %v1765_v0 }
  0x2b   :  { %1512 = vmatpush3.bf16.msra.mxu0 %v1687_v21  ;;  %v1718_v21 = vld [vmem:[%s2166_s1 + $0x188] sm:$0xff]  }
  0x2c   :  { %1513 = vmatprep.subr.bf16.mxu0 %v1765_v0 }
  0x2f   :  { %1514 = vmatpush3.bf16.msra.mxu0 %v1688_v22  ;;  %v1719_v22 = vld [vmem:[%s2166_s1 + $0x190] sm:$0xff]  }
  0x30   :  { %1515 = vmatprep.subr.bf16.mxu0 %v1765_v0 }
  0x33   :  { %1516 = vmatpush3.bf16.msra.mxu0 %v1689_v31  ;;  %v1721_v31 = vld [vmem:[%s2166_s1 + $0x1a0] sm:$0xff]  }
  0x34   :  { %1517 = vmatprep.subr.bf16.mxu0 %v1765_v0 }
  0x37   :  { %1518 = vmatpush3.bf16.msra.mxu0 %v1690_v32  ;;  %v1722_v32 = vld [vmem:[%s2166_s1 + $0x1a8] sm:$0xff]  }
  0x38   :  { %1519 = vmatprep.subr.bf16.mxu0 %v1765_v0 }
  0x3b   :  { %1520 = vmatpush3.bf16.msra.mxu0 %v1691_v33  ;;  %v1723_v33 = vld [vmem:[%s2166_s1 + $0x1b0] sm:$0xff]  }
  0x3c   :  { %1521 = vmatprep.subr.bf16.mxu0 %v1765_v0 }
  0x3f   :  { %1522 = vmatpush3.bf16.msra.mxu0 %v1692_v34  ;;  %v1724_v34 = vld [vmem:[%s2166_s1 + $0x1b8] sm:$0xff]  }
  0x40   :  { %1547 = vmatprep.subr.bf16.mxu0 %v1765_v0 }
  0xf5   :  { %v122_v24 = vpop.f32.mrb[0].mxu0 }
  0xf6   :  { %v123_v25 = vadd.f32 %v1140_v23, %v122_v24  ;;  %v1485_v26 = vpop.f32.mrb[1].mxu0  ;;  %v1720_v23 = vld [vmem:[%s2166_s1 + $0x198] sm:$0xff]   ;;  %v1243_v24 = vld [vmem:[%s2168_s2 + $0x4] ss:$0 sm:$0xff] }
  0xf7   :  { %v125_v27 = vpop.f32.mrb[2].mxu0 }
  0xf8   :  { %1749 = vtanh.f32 %v123_v25  ;;  %v1486_v28 = vpop.f32.mrb[3].mxu0 }
 0x102   :  { %v1750_v29 = vpop.eup %1749 }
 0x103   :  { %v129_v30 = vpack.c.bf16 %v1750_v29, %v1750_v29 }
 0x105   :  { %1504 = vmatmul.mubr.bf16.vlgmr.msra.gmra.mrb[0].mxu1 %v129_v30 }
 0x106   :  { %1543 = vmatprep.mubr.msk.bf16.mxu1 %vm1766_vm0, %v1765_v0  ;;  %1528 = vmatpush3.bf16.msra.mxu1 %v1693_v35  ;;  %v1725_v35 = vld [vmem:[%s2166_s1 + $0x1c0] sm:$0xff]  }
 0x107   :  { %1529 = vmatprep.subr.bf16.mxu1 %v1765_v0 }
 0x10a   :  { %1530 = vmatpush3.bf16.msra.mxu1 %v1694_v36  ;;  %v1726_v36 = vld [vmem:[%s2166_s1 + $0x1c8] sm:$0xff]  }
 0x10b   :  { %1531 = vmatprep.subr.bf16.mxu1 %v1765_v0 }
 0x10e   :  { %1532 = vmatpush3.bf16.msra.mxu1 %v1695_v37  ;;  %v1727_v37 = vld [vmem:[%s2166_s1 + $0x1d0] sm:$0xff]  }
 0x10f   :  { %1533 = vmatprep.subr.bf16.mxu1 %v1765_v0 }
 0x112   :  { %1534 = vmatpush3.bf16.msra.mxu1 %v1696_v38  ;;  %v1728_v38 = vld [vmem:[%s2166_s1 + $0x1d8] sm:$0xff]  }
 0x113   :  { %1535 = vmatprep.subr.bf16.mxu1 %v1765_v0 }
 0x116   :  { %1536 = vmatpush3.bf16.msra.mxu1 %v1697_v47  ;;  %v1729_v47 = vld [vmem:[%s2166_s1 + $0x1e0] sm:$0xff]  }
 0x117   :  { %1537 = vmatprep.subr.bf16.mxu1 %v1765_v0 }
 0x11a   :  { %1538 = vmatpush3.bf16.msra.mxu1 %v1698_v48  ;;  %v1730_v48 = vld [vmem:[%s2166_s1 + $0x1e8] sm:$0xff]  }
 0x11b   :  { %1539 = vmatprep.subr.bf16.mxu1 %v1765_v0 }
 0x11e   :  { %1540 = vmatpush3.bf16.msra.mxu1 %v1699_v49  ;;  %v1731_v49 = vld [vmem:[%s2166_s1 + $0x1f0] sm:$0xff]  }
 0x11f   :  { %1541 = vmatprep.subr.bf16.mxu1 %v1765_v0 }
 0x122   :  { %1542 = vmatpush3.bf16.msra.mxu1 %v1700_v50  ;;  %v1732_v50 = vld [vmem:[%s2166_s1 + $0x1f8] sm:$0xff]  }
 0x123   :  { %1567 = vmatprep.subr.bf16.mxu1 %v1765_v0 }
 0x1d8   :  { %v234_v40 = vpop.f32.mrb[0].mxu1 }
 0x1d9   :  { %v235_v41 = vadd.f32 %v1168_v39, %v234_v40  ;;  %v1505_v42 = vpop.f32.mrb[1].mxu1  ;;  %v1268_v39 = vld [vmem:[%s2168_s2 + $0x5] ss:$0 sm:$0xff] }
 0x1da   :  { %v237_v43 = vpop.f32.mrb[2].mxu1 }
 0x1db   :  { %1751 = vtanh.f32 %v235_v41  ;;  %v1506_v44 = vpop.f32.mrb[3].mxu1 }
 0x1e5   :  { %v1752_v45 = vpop.eup %1751 }
 0x1e6   :  { %v241_v46 = vpack.c.bf16 %v1752_v45, %v1752_v45 }
 0x1e8   :  { %1524 = vmatmul.mubr.bf16.vlgmr.msra.gmra.mrb[4].mxu0 %v241_v46 }
 0x1e9   :  { %1563 = vmatprep.mubr.msk.bf16.mxu0 %vm1766_vm0, %v1765_v0  ;;  %1548 = vmatpush3.bf16.msra.mxu0 %v1701_v51  ;;  %v1733_v51 = vld [vmem:[%s2166_s1 + $0x200] sm:$0xff]  }
 0x1ea   :  { %1549 = vmatprep.subr.bf16.mxu0 %v1765_v0 }
 0x1ed   :  { %1550 = vmatpush3.bf16.msra.mxu0 %v1702_v52  ;;  %v1734_v52 = vld [vmem:[%s2166_s1 + $0x208] sm:$0xff]  }
 0x1ee   :  { %1551 = vmatprep.subr.bf16.mxu0 %v1765_v0 }
 0x1f1   :  { %1552 = vmatpush3.bf16.msra.mxu0 %v1703_v53  ;;  %v1735_v53 = vld [vmem:[%s2166_s1 + $0x210] sm:$0xff]  }
 0x1f2   :  { %1553 = vmatprep.subr.bf16.mxu0 %v1765_v0 }
 0x1f5   :  { %1554 = vmatpush3.bf16.msra.mxu0 %v1704_v54  ;;  %v1736_v54 = vld [vmem:[%s2166_s1 + $0x218] sm:$0xff]  }
 0x1f6   :  { %1555 = vmatprep.subr.bf16.mxu0 %v1765_v0 }
 0x1f9   :  { %1556 = vmatpush3.bf16.msra.mxu0 %v1705_v63  ;;  %v1737_v63 = vld [vmem:[%s2166_s1 + $0x220] sm:$0xff]  }
 0x1fa   :  { %1557 = vmatprep.subr.bf16.mxu0 %v1765_v0 }
 0x1fd   :  { %1558 = vmatpush3.bf16.msra.mxu0 %v1706_v1  ;;  %v1738_v1 = vld [vmem:[%s2166_s1 + $0x228] sm:$0xff]  }
 0x1fe   :  { %1559 = vmatprep.subr.bf16.mxu0 %v1765_v0 }
 0x201   :  { %1560 = vmatpush3.bf16.msra.mxu0 %v1707_v2  ;;  %v1739_v2 = vld [vmem:[%s2166_s1 + $0x230] sm:$0xff]  }
 0x202   :  { %1561 = vmatprep.subr.bf16.mxu0 %v1765_v0 }
 0x205   :  { %1562 = vmatpush3.bf16.msra.mxu0 %v1708_v3  ;;  %v1740_v3 = vld [vmem:[%s2166_s1 + $0x238] sm:$0xff]  }
 0x206   :  { %1587 = vmatprep.subr.bf16.mxu0 %v1765_v0 }
 0x2bb   :  { %v346_v56 = vpop.f32.mrb[4].mxu0 }
 0x2bc   :  { %v347_v57 = vadd.f32 %v1193_v55, %v346_v56  ;;  %v1525_v58 = vpop.f32.mrb[5].mxu0  ;;  %v1293_v55 = vld [vmem:[%s2168_s2 + $0x6] ss:$0 sm:$0xff] }
 0x2bd   :  { %v349_v59 = vpop.f32.mrb[6].mxu0 }
 0x2be   :  { %1753 = vtanh.f32 %v347_v57  ;;  %v1526_v60 = vpop.f32.mrb[7].mxu0 }
 0x2c8   :  { %v1754_v61 = vpop.eup %1753 }
 0x2c9   :  { %v353_v62 = vpack.c.bf16 %v1754_v61, %v1754_v61 }
 0x2cb   :  { %1544 = vmatmul.mubr.bf16.vlgmr.msra.gmra.mrb[4].mxu1 %v353_v62 }
 0x2cc   :  { %1583 = vmatprep.mubr.msk.bf16.mxu1 %vm1766_vm0, %v1765_v0  ;;  %1568 = vmatpush3.bf16.msra.mxu1 %v1709_v4  ;;  %v1741_v4 = vld [vmem:[%s2166_s1 + $0x240] sm:$0xff]  }
 0x2cd   :  { %1569 = vmatprep.subr.bf16.mxu1 %v1765_v0 }
 0x2d0   :  { %1570 = vmatpush3.bf16.msra.mxu1 %v1710_v5  ;;  %v1742_v5 = vld [vmem:[%s2166_s1 + $0x248] sm:$0xff]  }
 0x2d1   :  { %1571 = vmatprep.subr.bf16.mxu1 %v1765_v0 }
 0x2d4   :  { %1572 = vmatpush3.bf16.msra.mxu1 %v1711_v6  ;;  %v1743_v6 = vld [vmem:[%s2166_s1 + $0x250] sm:$0xff]  }
 0x2d5   :  { %1573 = vmatprep.subr.bf16.mxu1 %v1765_v0 }
 0x2d8   :  { %1574 = vmatpush3.bf16.msra.mxu1 %v1712_v7  ;;  %v1744_v7 = vld [vmem:[%s2166_s1 + $0x258] sm:$0xff]  }
 0x2d9   :  { %1575 = vmatprep.subr.bf16.mxu1 %v1765_v0 }
 0x2dc   :  { %1576 = vmatpush3.bf16.msra.mxu1 %v1713_v8  ;;  %v1318_v8 = vld [vmem:[%s2168_s2 + $0x7] ss:$0 sm:$0xff] }
 0x2dd   :  { %1577 = vmatprep.subr.bf16.mxu1 %v1765_v0 }
 0x2e0   :  { %1578 = vmatpush3.bf16.msra.mxu1 %v1714_v9 }
 0x2e1   :  { %1579 = vmatprep.subr.bf16.mxu1 %v1765_v0 }
 0x2e4   :  { %1580 = vmatpush3.bf16.msra.mxu1 %v1715_v10 }
 0x2e5   :  { %1581 = vmatprep.subr.bf16.mxu1 %v1765_v0 }
 0x2e8   :  { %1582 = vmatpush3.bf16.msra.mxu1 %v1716_v19  ;;  %v1748_v19 = vld [vmem:[%s2166_s1 + $0x278] sm:$0xff]  }
 0x2e9   :  { %1607 = vmatprep.subr.bf16.mxu1 %v1765_v0 }
 0x39e   :  { %v458_v12 = vpop.f32.mrb[4].mxu1 }
 0x39f   :  { %v459_v13 = vadd.f32 %v1218_v11, %v458_v12  ;;  %v1545_v14 = vpop.f32.mrb[5].mxu1 }
 0x3a0   :  { %v461_v15 = vpop.f32.mrb[6].mxu1 }
 0x3a1   :  { %1755 = vtanh.f32 %v459_v13  ;;  %v1546_v16 = vpop.f32.mrb[7].mxu1 }
 0x3a2   :  { %v1745_v16 = vld [vmem:[%s2166_s1 + $0x260] sm:$0xff]  }
 0x3ab   :  { %v1756_v17 = vpop.eup %1755 }
 0x3ac   :  { %v465_v18 = vpack.c.bf16 %v1756_v17, %v1756_v17  ;;  %v1746_v17 = vld [vmem:[%s2166_s1 + $0x268] sm:$0xff]  }
 0x3ae   :  { %1564 = vmatmul.mubr.bf16.vlgmr.msra.gmra.mrb[8].mxu0 %v465_v18  ;;  %v1747_v18 = vld [vmem:[%s2166_s1 + $0x270] sm:$0xff]  }
 0x3af   :  { %1603 = vmatprep.mubr.msk.bf16.mxu0 %vm1766_vm0, %v1765_v0  ;;  %1588 = vmatpush3.bf16.msra.mxu0 %v1717_v20  ;;  %v1343_v20 = vld [vmem:[%s2168_s2 + $0x8] ss:$0 sm:$0xff] }
 0x3b0   :  { %1589 = vmatprep.subr.bf16.mxu0 %v1765_v0 }
 0x3b3   :  { %1590 = vmatpush3.bf16.msra.mxu0 %v1718_v21 }
 0x3b4   :  { %1591 = vmatprep.subr.bf16.mxu0 %v1765_v0 }
 0x3b7   :  { %1592 = vmatpush3.bf16.msra.mxu0 %v1719_v22 }
 0x3b8   :  { %1593 = vmatprep.subr.bf16.mxu0 %v1765_v0 }
 0x3bb   :  { %1594 = vmatpush3.bf16.msra.mxu0 %v1720_v23 }
 0x3bc   :  { %1595 = vmatprep.subr.bf16.mxu0 %v1765_v0 }
 0x3bf   :  { %1596 = vmatpush3.bf16.msra.mxu0 %v1721_v31 }
 0x3c0   :  { %1597 = vmatprep.subr.bf16.mxu0 %v1765_v0 }
 0x3c3   :  { %1598 = vmatpush3.bf16.msra.mxu0 %v1722_v32 }
 0x3c4   :  { %1599 = vmatprep.subr.bf16.mxu0 %v1765_v0 }
 0x3c7   :  { %1600 = vmatpush3.bf16.msra.mxu0 %v1723_v33 }
 0x3c8   :  { %1601 = vmatprep.subr.bf16.mxu0 %v1765_v0 }
 0x3cb   :  { %1602 = vmatpush3.bf16.msra.mxu0 %v1724_v34 }
 0x3cc   :  { %1627 = vmatprep.subr.bf16.mxu0 %v1765_v0 }
 0x481   :  { %v570_v25 = vpop.f32.mrb[8].mxu0 }
 0x482   :  { %v571_v26 = vadd.f32 %v1243_v24, %v570_v25  ;;  %v1565_v27 = vpop.f32.mrb[9].mxu0 }
 0x483   :  { %v573_v28 = vpop.f32.mrb[10].mxu0 }
 0x484   :  { %v576_v29 = vpack.c.bf16 %v571_v26, %v571_v26  ;;  %v1566_v30 = vpop.f32.mrb[11].mxu0 }
 0x486   :  { %1584 = vmatmul.mubr.bf16.vlgmr.msra.gmra.mrb[8].mxu1 %v576_v29 }
 0x487   :  { %1623 = vmatprep.mubr.msk.bf16.mxu1 %vm1766_vm0, %v1765_v0  ;;  %1608 = vmatpush3.bf16.msra.mxu1 %v1725_v35 }
 0x488   :  { %1609 = vmatprep.subr.bf16.mxu1 %v1765_v0 }
 0x48b   :  { %1610 = vmatpush3.bf16.msra.mxu1 %v1726_v36 }
 0x48c   :  { %1611 = vmatprep.subr.bf16.mxu1 %v1765_v0 }
 0x48f   :  { %1612 = vmatpush3.bf16.msra.mxu1 %v1727_v37 }
 0x490   :  { %1613 = vmatprep.subr.bf16.mxu1 %v1765_v0 }
 0x493   :  { %1614 = vmatpush3.bf16.msra.mxu1 %v1728_v38 }
 0x494   :  { %1615 = vmatprep.subr.bf16.mxu1 %v1765_v0 }
 0x497   :  { %1616 = vmatpush3.bf16.msra.mxu1 %v1729_v47 }
 0x498   :  { %1617 = vmatprep.subr.bf16.mxu1 %v1765_v0 }
 0x49b   :  { %1618 = vmatpush3.bf16.msra.mxu1 %v1730_v48 }
 0x49c   :  { %1619 = vmatprep.subr.bf16.mxu1 %v1765_v0 }
 0x49f   :  { %1620 = vmatpush3.bf16.msra.mxu1 %v1731_v49 }
 0x4a0   :  { %1621 = vmatprep.subr.bf16.mxu1 %v1765_v0 }
 0x4a3   :  { %1622 = vmatpush3.bf16.msra.mxu1 %v1732_v50 }
 0x4a4   :  { %1647 = vmatprep.subr.bf16.mxu1 %v1765_v0 }
 0x559   :  { %v681_v40 = vpop.f32.mrb[8].mxu1 }
 0x55a   :  { %v682_v41 = vadd.f32 %v1268_v39, %v681_v40  ;;  %v1585_v42 = vpop.f32.mrb[9].mxu1 }
 0x55b   :  { %v684_v43 = vpop.f32.mrb[10].mxu1 }
 0x55c   :  { %1757 = vtanh.f32 %v682_v41  ;;  %v1586_v44 = vpop.f32.mrb[11].mxu1 }
 0x566   :  { %v1758_v45 = vpop.eup %1757 }
 0x567   :  { %v688_v46 = vpack.c.bf16 %v1758_v45, %v1758_v45 }
 0x569   :  { %1604 = vmatmul.mubr.bf16.vlgmr.msra.gmra.mrb[12].mxu0 %v688_v46 }
 0x56a   :  { %1643 = vmatprep.mubr.msk.bf16.mxu0 %vm1766_vm0, %v1765_v0  ;;  %1628 = vmatpush3.bf16.msra.mxu0 %v1733_v51 }
 0x56b   :  { %1629 = vmatprep.subr.bf16.mxu0 %v1765_v0 }
 0x56e   :  { %1630 = vmatpush3.bf16.msra.mxu0 %v1734_v52 }
 0x56f   :  { %1631 = vmatprep.subr.bf16.mxu0 %v1765_v0 }
 0x572   :  { %1632 = vmatpush3.bf16.msra.mxu0 %v1735_v53 }
 0x573   :  { %1633 = vmatprep.subr.bf16.mxu0 %v1765_v0 }
 0x576   :  { %1634 = vmatpush3.bf16.msra.mxu0 %v1736_v54 }
 0x577   :  { %1635 = vmatprep.subr.bf16.mxu0 %v1765_v0 }
 0x57a   :  { %1636 = vmatpush3.bf16.msra.mxu0 %v1737_v63 }
 0x57b   :  { %1637 = vmatprep.subr.bf16.mxu0 %v1765_v0 }
 0x57e   :  { %1638 = vmatpush3.bf16.msra.mxu0 %v1738_v1 }
 0x57f   :  { %1639 = vmatprep.subr.bf16.mxu0 %v1765_v0 }
 0x582   :  { %1640 = vmatpush3.bf16.msra.mxu0 %v1739_v2 }
 0x583   :  { %1641 = vmatprep.subr.bf16.mxu0 %v1765_v0 }
 0x586   :  { %1642 = vmatpush3.bf16.msra.mxu0 %v1740_v3 }
 0x63c   :  { %v793_v56 = vpop.f32.mrb[12].mxu0 }
 0x63d   :  { %v794_v57 = vadd.f32 %v1293_v55, %v793_v56  ;;  %v1605_v58 = vpop.f32.mrb[13].mxu0 }
 0x63e   :  { %v796_v59 = vpop.f32.mrb[14].mxu0 }
 0x63f   :  { %1759 = vtanh.f32 %v794_v57  ;;  %v1606_v60 = vpop.f32.mrb[15].mxu0 }
 0x649   :  { %v1760_v61 = vpop.eup %1759 }
 0x64a   :  { %v800_v62 = vpack.c.bf16 %v1760_v61, %v1760_v61 }
 0x64c   :  { %1624 = vmatmul.mubr.bf16.vlgmr.msra.gmra.mrb[12].mxu1 %v800_v62 }
 0x64d   :  { %1663 = vmatprep.mubr.msk.bf16.mxu1 %vm1766_vm0, %v1765_v0  ;;  %1648 = vmatpush3.bf16.msra.mxu1 %v1741_v4 }
 0x64e   :  { %1649 = vmatprep.subr.bf16.mxu1 %v1765_v0 }
 0x651   :  { %1650 = vmatpush3.bf16.msra.mxu1 %v1742_v5 }
 0x652   :  { %1651 = vmatprep.subr.bf16.mxu1 %v1765_v0 }
 0x655   :  { %1652 = vmatpush3.bf16.msra.mxu1 %v1743_v6 }
 0x656   :  { %1653 = vmatprep.subr.bf16.mxu1 %v1765_v0 }
 0x659   :  { %1654 = vmatpush3.bf16.msra.mxu1 %v1744_v7 }
 0x65a   :  { %1655 = vmatprep.subr.bf16.mxu1 %v1765_v0 }
 0x65d   :  { %1656 = vmatpush3.bf16.msra.mxu1 %v1745_v16 }
 0x65e   :  { %1657 = vmatprep.subr.bf16.mxu1 %v1765_v0 }
 0x661   :  { %1658 = vmatpush3.bf16.msra.mxu1 %v1746_v17 }
 0x662   :  { %1659 = vmatprep.subr.bf16.mxu1 %v1765_v0 }
 0x665   :  { %1660 = vmatpush3.bf16.msra.mxu1 %v1747_v18 }
 0x666   :  { %1661 = vmatprep.subr.bf16.mxu1 %v1765_v0  ;;  %v1368_v0 = vld [vmem:[%s2168_s2 + $0x9] ss:$0 sm:$0xff] }
 0x669   :  { %1662 = vmatpush3.bf16.msra.mxu1 %v1748_v19 }
 0x71f   :  { %v905_v9 = vpop.f32.mrb[12].mxu1 }
 0x720   :  { %v906_v10 = vadd.f32 %v1318_v8, %v905_v9  ;;  %v1625_v11 = vpop.f32.mrb[13].mxu1 }
 0x721   :  { %v908_v12 = vpop.f32.mrb[14].mxu1 }
 0x722   :  { %1761 = vtanh.f32 %v906_v10  ;;  %v1626_v13 = vpop.f32.mrb[15].mxu1 }
 0x72c   :  { %v1762_v14 = vpop.eup %1761 }
 0x72d   :  { %v912_v15 = vpack.c.bf16 %v1762_v14, %v1762_v14 }
 0x72f   :  { %1644 = vmatmul.mubr.bf16.vlgmr.msra.gmra.mrb[16].mxu0 %v912_v15 }
 0x802   :  { %v1017_v21 = vpop.f32.mrb[16].mxu0 }
 0x803   :  { %v1018_v22 = vadd.f32 %v1343_v20, %v1017_v21  ;;  %v1645_v23 = vpop.f32.mrb[17].mxu0 }
 0x804   :  { %v1020_v24 = vpop.f32.mrb[18].mxu0 }
 0x805   :  { %1763 = vtanh.f32 %v1018_v22  ;;  %v1646_v25 = vpop.f32.mrb[19].mxu0 }
 0x80f   :  { %v1764_v26 = vpop.eup %1763 }
 0x810   :  { %v1024_v27 = vpack.c.bf16 %v1764_v26, %v1764_v26 }
 0x812   :  { %1664 = vmatmul.mubr.bf16.vlgmr.msra.gmra.mrb[16].mxu1 %v1024_v27 }
 0x8e5   :  { %v1129_v28 = vpop.f32.mrb[16].mxu1 }
 0x8e6   :  { %v1130_v29 = vadd.f32 %v1368_v0, %v1129_v28  ;;  %v1665_v30 = vpop.f32.mrb[17].mxu1 }
 0x8e7   :  { %v1132_v31 = vpop.f32.mrb[18].mxu1 }
 0x8e8   :  { %1135 = vst.msk [vmem:[%s2169_s3] sm:$0xff] %vm16_vm1, %v1130_v29  ;;  %v1666_v32 = vpop.f32.mrb[19].mxu1 }

</bundles_post_ra>
